<compile_context>
chip_gen: v7x
topology: tpu7x:2x2x1
jax: 0.10.0
libtpu: 0.0.40
codegen_flags: <defaults>
</compile_context>

<pallas_src>
import numpy as np

import jax
import jax.numpy as jnp
from jax import lax
from jax.experimental import pallas as pl
from jax.experimental.pallas import tpu as pltpu


def _make_qf_attention_kernel(H, W, C):
    HW = H * W

    def kernel(x_ref, w1_ref, b1_ref, w2_ref, b2_ref, g_ref, bt_ref, m_ref,
               out_ref, pad_ref, col_ref):
        # x_ref:   (1, C, HW)        one batch element, channels on sublanes
        # w*_ref:  (C, 9*C)          packed weights: w[o, (ky*3+kx)*C + i]
        # b*_ref:  (C, 1)
        # g_ref:   (1, C, 1), bt_ref: (1, C, 1)
        # m_ref:   (2, HW)           row 0: valid if w != 0, row 1: valid if w != W-1
        # out_ref: (1, C, HW)
        # pad_ref: (C, (H+4)*W)      flat image, padded by 2 zero rows top/bottom
        # col_ref: (9*C, HW)         im2col buffer
        m_left = m_ref[0:1, :]            # (1, HW)
        m_right = m_ref[1:2, :]           # (1, HW)

        # Zero only the halo rows (2 above + 2 below the image).  Done every
        # grid step (cheap: 2 * C * 2W lanes) instead of once under
        # pl.when(program_id == 0), so it stays correct when the 'parallel'
        # batch axis is split across megacore TensorCores (each core has its
        # own scratch and may never see program_id == 0).
        zeros_border = jnp.zeros((C, 2 * W), jnp.float32)
        pad_ref[:, 0:2 * W] = zeros_border
        pad_ref[:, 2 * W + HW:4 * W + HW] = zeros_border

        def conv3x3(w_ref, b_ref):
            # Build im2col: 9 contiguous lane slices of the flat padded image.
            for ky in range(3):
                for kx in range(3):
                    tap = ky * 3 + kx
                    off = (ky + 1) * W + (kx - 1)          # static lane offset
                    win = pad_ref[:, off:off + HW]         # (C, HW), no reshape
                    if kx == 0:                            # mask row-wrap at w == 0
                        win = win * m_left
                    elif kx == 2:                          # mask row-wrap at w == W-1
                        win = win * m_right
                    col_ref[tap * C:(tap + 1) * C, :] = win
            # Single MXU matmul per conv: (C, 9C) x (9C, HW) -> (C, HW).
            return jnp.dot(w_ref[...], col_ref[...],
                           preferred_element_type=jnp.float32) + b_ref[...]

        x = x_ref[0]                                       # (C, HW)

        # conv1
        pad_ref[:, 2 * W:2 * W + HW] = x
        y1 = conv3x3(w1_ref, b1_ref)

        # ReLU streamed directly back into the pad scratch for conv2
        pad_ref[:, 2 * W:2 * W + HW] = jnp.maximum(y1, 0.0)
        y2 = conv3x3(w2_ref, b2_ref)

        # QF modulation + residual: gamma/beta broadcast (C,1) -> (C,HW).
        out_ref[0] = x + g_ref[0] * y2 + bt_ref[0]

    return kernel


def qf_attention_pallas(x_nchw, w1_oihw, b1, w2_oihw, b2, gamma, beta):
    """x: (N,C,H,W) f32; w*: (C,C,3,3) OIHW; b*: (C,); gamma/beta: (N,C)."""
    N, C, H, W = x_nchw.shape
    HW = H * W

    # Lane-dense layout: flatten spatial dims onto the lane axis.
    x_flat = x_nchw.reshape(N, C, HW)

    # Pack weights OIHW -> (O, 9*I), tap-major / cin-minor (matches col buffer).
    w1m = jnp.transpose(w1_oihw, (0, 2, 3, 1)).reshape(C, 9 * C)
    w2m = jnp.transpose(w2_oihw, (0, 2, 3, 1)).reshape(C, 9 * C)
    b1c = b1.reshape(C, 1)
    b2c = b2.reshape(C, 1)
    g3 = gamma.reshape(N, C, 1)
    bt3 = beta.reshape(N, C, 1)

    # Precomputed (host-side) W-edge validity masks, hoisted out of the kernel.
    wcol = np.arange(HW, dtype=np.int32) % W
    masks = jnp.asarray(
        np.stack([(wcol > 0), (wcol < W - 1)]).astype(np.float32))   # (2, HW)

    img_spec = pl.BlockSpec((1, C, HW), lambda b: (b, 0, 0))
    w_spec = pl.BlockSpec((C, 9 * C), lambda b: (0, 0))
    b_spec = pl.BlockSpec((C, 1), lambda b: (0, 0))
    gb_spec = pl.BlockSpec((1, C, 1), lambda b: (b, 0, 0))
    m_spec = pl.BlockSpec((2, HW), lambda b: (0, 0))

    out_flat = pl.pallas_call(
        _make_qf_attention_kernel(H, W, C),
        out_shape=jax.ShapeDtypeStruct((N, C, HW), jnp.float32),
        grid_spec=pltpu.PrefetchScalarGridSpec(
            num_scalar_prefetch=0,
            grid=(N,),
            in_specs=[img_spec, w_spec, b_spec, w_spec, b_spec,
                      gb_spec, gb_spec, m_spec],
            out_specs=img_spec,
            scratch_shapes=[
                pltpu.VMEM((C, (H + 4) * W), jnp.float32),   # flat padded image
                pltpu.VMEM((9 * C, HW), jnp.float32),        # im2col buffer
            ],
        ),
        compiler_params=pltpu.CompilerParams(
            dimension_semantics=("parallel",)),
    )(x_flat, w1m, b1c, w2m, b2c, g3, bt3, masks)

    return out_flat.reshape(N, C, H, W)


def qf_attention_reference(x_nchw, w1_oihw, b1, w2_oihw, b2, gamma, beta):
    """Pure-JAX reference mirroring the PyTorch forward (NCHW)."""
    dn = ('NCHW', 'OIHW', 'NCHW')
    y = lax.conv_general_dilated(x_nchw, w1_oihw, (1, 1), ((1, 1), (1, 1)),
                                 dimension_numbers=dn) + b1[None, :, None, None]
    y = jnp.maximum(y, 0.0)
    y = lax.conv_general_dilated(y, w2_oihw, (1, 1), ((1, 1), (1, 1)),
                                 dimension_numbers=dn) + b2[None, :, None, None]
    res = gamma[:, :, None, None] * y + beta[:, :, None, None]
    return x_nchw + res


if __name__ == "__main__":
    N, C, H, W = 2, 4, 16, 16

    key = jax.random.PRNGKey(0)
    kx, kw1, kb1, kw2, kb2, kg, kbt = jax.random.split(key, 7)

    scale = 1.0 / (C * 9) ** 0.5
    x_nchw = jax.random.normal(kx, (N, C, H, W), jnp.float32)
    w1_oihw = jax.random.normal(kw1, (C, C, 3, 3), jnp.float32) * scale
    b1 = jax.random.normal(kb1, (C,), jnp.float32) * scale
    w2_oihw = jax.random.normal(kw2, (C, C, 3, 3), jnp.float32) * scale
    b2 = jax.random.normal(kb2, (C,), jnp.float32) * scale
    gamma = jax.random.normal(kg, (N, C), jnp.float32)
    beta = jax.random.normal(kbt, (N, C), jnp.float32)

    out = qf_attention_pallas(x_nchw, w1_oihw, b1, w2_oihw, b2, gamma, beta)
    out = jax.block_until_ready(out)

    ref = qf_attention_reference(x_nchw, w1_oihw, b1, w2_oihw, b2, gamma, beta)
    max_err = float(jnp.max(jnp.abs(out - ref)))
    assert jnp.allclose(out, ref, atol=1e-4, rtol=1e-4), max_err

    print("KERNEL_OK")
</pallas_src>

<mosaic_0001>
module attributes {stable_mosaic.version = 11 : i64} {
  func.func @kernel(%arg0: i32, %arg1: memref<1x4x256xf32, #tpu.memory_space<vmem>>, %arg2: memref<4x36xf32, #tpu.memory_space<vmem>>, %arg3: memref<4x1xf32, #tpu.memory_space<vmem>>, %arg4: memref<4x36xf32, #tpu.memory_space<vmem>>, %arg5: memref<4x1xf32, #tpu.memory_space<vmem>>, %arg6: memref<1x4x1xf32, #tpu.memory_space<vmem>>, %arg7: memref<1x4x1xf32, #tpu.memory_space<vmem>>, %arg8: memref<2x256xf32, #tpu.memory_space<vmem>>, %arg9: memref<1x4x256xf32, #tpu.memory_space<vmem>>, %arg10: memref<4x320xf32, #tpu.memory_space<vmem>>, %arg11: memref<36x256xf32, #tpu.memory_space<vmem>>) attributes {dimension_semantics = [#tpu.dimension_semantics<parallel>], iteration_bounds = array<i64: 2>, scalar_prefetch = 0 : i64, scratch_operands = 2 : i64, tpu.core_type = #tpu.core_type<tc>, window_params = [{transform_indices = @transform_0, window_bounds = array<i64: 1, 4, 256>}, {pipeline_mode = #tpu.pipeline_mode<synchronous>, transform_indices = @transform_1, window_bounds = array<i64: 4, 36>}, {pipeline_mode = #tpu.pipeline_mode<synchronous>, transform_indices = @transform_2, window_bounds = array<i64: 4, 1>}, {pipeline_mode = #tpu.pipeline_mode<synchronous>, transform_indices = @transform_3, window_bounds = array<i64: 4, 36>}, {pipeline_mode = #tpu.pipeline_mode<synchronous>, transform_indices = @transform_4, window_bounds = array<i64: 4, 1>}, {transform_indices = @transform_5, window_bounds = array<i64: 1, 4, 1>}, {transform_indices = @transform_6, window_bounds = array<i64: 1, 4, 1>}, {pipeline_mode = #tpu.pipeline_mode<synchronous>, transform_indices = @transform_7, window_bounds = array<i64: 2, 256>}, {transform_indices = @transform_8, window_bounds = array<i64: 1, 4, 256>}]} {
    %c0 = arith.constant 0 : index
    %c0_0 = arith.constant 0 : index
    %0 = vector.load %arg8[%c0, %c0_0] : memref<2x256xf32, #tpu.memory_space<vmem>>, vector<1x256xf32>
    %c1 = arith.constant 1 : index
    %c0_1 = arith.constant 0 : index
    %1 = vector.load %arg8[%c1, %c0_1] : memref<2x256xf32, #tpu.memory_space<vmem>>, vector<1x256xf32>
    %cst = arith.constant 0.000000e+00 : f32
    %2 = vector.broadcast %cst : f32 to vector<4x32xf32>
    %c0_2 = arith.constant 0 : index
    %c0_3 = arith.constant 0 : index
    %3 = vector.load %arg10[%c0_2, %c0_3] : memref<4x320xf32, #tpu.memory_space<vmem>>, vector<4x32xf32>
    tpu.vector_store %arg10[%c0_2, %c0_3], %2 {strides = array<i32>} : memref<4x320xf32, #tpu.memory_space<vmem>>, vector<4x32xf32>,
    %c0_4 = arith.constant 0 : index
    %c288 = arith.constant 288 : index
    %4 = vector.load %arg10[%c0_4, %c288] : memref<4x320xf32, #tpu.memory_space<vmem>>, vector<4x32xf32>
    tpu.vector_store %arg10[%c0_4, %c288], %2 {strides = array<i32>} : memref<4x320xf32, #tpu.memory_space<vmem>>, vector<4x32xf32>,
    %c0_5 = arith.constant 0 : index
    %c0_6 = arith.constant 0 : index
    %c0_7 = arith.constant 0 : index
    %5 = vector.load %arg1[%c0_5, %c0_6, %c0_7] : memref<1x4x256xf32, #tpu.memory_space<vmem>>, vector<1x4x256xf32>
    %6 = vector.shape_cast %5 : vector<1x4x256xf32> to vector<4x256xf32>
    %c0_8 = arith.constant 0 : index
    %c32 = arith.constant 32 : index
    %7 = vector.load %arg10[%c0_8, %c32] : memref<4x320xf32, #tpu.memory_space<vmem>>, vector<4x256xf32>
    tpu.vector_store %arg10[%c0_8, %c32], %6 {strides = array<i32>} : memref<4x320xf32, #tpu.memory_space<vmem>>, vector<4x256xf32>,
    %c0_9 = arith.constant 0 : index
    %c15 = arith.constant 15 : index
    %8 = vector.load %arg10[%c0_9, %c15] : memref<4x320xf32, #tpu.memory_space<vmem>>, vector<4x256xf32>
    %9 = vector.broadcast %0 : vector<1x256xf32> to vector<4x256xf32>
    %10 = arith.mulf %8, %9 : vector<4x256xf32>
    %c0_10 = arith.constant 0 : index
    %c0_11 = arith.constant 0 : index
    %11 = vector.load %arg11[%c0_10, %c0_11] : memref<36x256xf32, #tpu.memory_space<vmem>>, vector<4x256xf32>
    tpu.vector_store %arg11[%c0_10, %c0_11], %10 {strides = array<i32>} : memref<36x256xf32, #tpu.memory_space<vmem>>, vector<4x256xf32>,
    %c0_12 = arith.constant 0 : index
    %c16 = arith.constant 16 : index
    %12 = vector.load %arg10[%c0_12, %c16] : memref<4x320xf32, #tpu.memory_space<vmem>>, vector<4x256xf32>
    %c4 = arith.constant 4 : index
    %c0_13 = arith.constant 0 : index
    %13 = vector.load %arg11[%c4, %c0_13] : memref<36x256xf32, #tpu.memory_space<vmem>>, vector<4x256xf32>
    tpu.vector_store %arg11[%c4, %c0_13], %12 {strides = array<i32>} : memref<36x256xf32, #tpu.memory_space<vmem>>, vector<4x256xf32>,
    %c0_14 = arith.constant 0 : index
    %c17 = arith.constant 17 : index
    %14 = vector.load %arg10[%c0_14, %c17] : memref<4x320xf32, #tpu.memory_space<vmem>>, vector<4x256xf32>
    %15 = vector.broadcast %1 : vector<1x256xf32> to vector<4x256xf32>
    %16 = arith.mulf %14, %15 : vector<4x256xf32>
    %c8 = arith.constant 8 : index
    %c0_15 = arith.constant 0 : index
    %17 = vector.load %arg11[%c8, %c0_15] : memref<36x256xf32, #tpu.memory_space<vmem>>, vector<4x256xf32>
    tpu.vector_store %arg11[%c8, %c0_15], %16 {strides = array<i32>} : memref<36x256xf32, #tpu.memory_space<vmem>>, vector<4x256xf32>,
    %c0_16 = arith.constant 0 : index
    %c31 = arith.constant 31 : index
    %18 = vector.load %arg10[%c0_16, %c31] : memref<4x320xf32, #tpu.memory_space<vmem>>, vector<4x256xf32>
    %19 = vector.broadcast %0 : vector<1x256xf32> to vector<4x256xf32>
    %20 = arith.mulf %18, %19 : vector<4x256xf32>
    %c12 = arith.constant 12 : index
    %c0_17 = arith.constant 0 : index
    %21 = vector.load %arg11[%c12, %c0_17] : memref<36x256xf32, #tpu.memory_space<vmem>>, vector<4x256xf32>
    tpu.vector_store %arg11[%c12, %c0_17], %20 {strides = array<i32>} : memref<36x256xf32, #tpu.memory_space<vmem>>, vector<4x256xf32>,
    %c0_18 = arith.constant 0 : index
    %c32_19 = arith.constant 32 : index
    %22 = vector.load %arg10[%c0_18, %c32_19] : memref<4x320xf32, #tpu.memory_space<vmem>>, vector<4x256xf32>
    %c16_20 = arith.constant 16 : index
    %c0_21 = arith.constant 0 : index
    %23 = vector.load %arg11[%c16_20, %c0_21] : memref<36x256xf32, #tpu.memory_space<vmem>>, vector<4x256xf32>
    tpu.vector_store %arg11[%c16_20, %c0_21], %22 {strides = array<i32>} : memref<36x256xf32, #tpu.memory_space<vmem>>, vector<4x256xf32>,
    %c0_22 = arith.constant 0 : index
    %c33 = arith.constant 33 : index
    %24 = vector.load %arg10[%c0_22, %c33] : memref<4x320xf32, #tpu.memory_space<vmem>>, vector<4x256xf32>
    %25 = vector.broadcast %1 : vector<1x256xf32> to vector<4x256xf32>
    %26 = arith.mulf %24, %25 : vector<4x256xf32>
    %c20 = arith.constant 20 : index
    %c0_23 = arith.constant 0 : index
    %27 = vector.load %arg11[%c20, %c0_23] : memref<36x256xf32, #tpu.memory_space<vmem>>, vector<4x256xf32>
    tpu.vector_store %arg11[%c20, %c0_23], %26 {strides = array<i32>} : memref<36x256xf32, #tpu.memory_space<vmem>>, vector<4x256xf32>,
    %c0_24 = arith.constant 0 : index
    %c47 = arith.constant 47 : index
    %28 = vector.load %arg10[%c0_24, %c47] : memref<4x320xf32, #tpu.memory_space<vmem>>, vector<4x256xf32>
    %29 = vector.broadcast %0 : vector<1x256xf32> to vector<4x256xf32>
    %30 = arith.mulf %28, %29 : vector<4x256xf32>
    %c24 = arith.constant 24 : index
    %c0_25 = arith.constant 0 : index
    %31 = vector.load %arg11[%c24, %c0_25] : memref<36x256xf32, #tpu.memory_space<vmem>>, vector<4x256xf32>
    tpu.vector_store %arg11[%c24, %c0_25], %30 {strides = array<i32>} : memref<36x256xf32, #tpu.memory_space<vmem>>, vector<4x256xf32>,
    %c0_26 = arith.constant 0 : index
    %c48 = arith.constant 48 : index
    %32 = vector.load %arg10[%c0_26, %c48] : memref<4x320xf32, #tpu.memory_space<vmem>>, vector<4x256xf32>
    %c28 = arith.constant 28 : index
    %c0_27 = arith.constant 0 : index
    %33 = vector.load %arg11[%c28, %c0_27] : memref<36x256xf32, #tpu.memory_space<vmem>>, vector<4x256xf32>
    tpu.vector_store %arg11[%c28, %c0_27], %32 {strides = array<i32>} : memref<36x256xf32, #tpu.memory_space<vmem>>, vector<4x256xf32>,
    %c0_28 = arith.constant 0 : index
    %c49 = arith.constant 49 : index
    %34 = vector.load %arg10[%c0_28, %c49] : memref<4x320xf32, #tpu.memory_space<vmem>>, vector<4x256xf32>
    %35 = vector.broadcast %1 : vector<1x256xf32> to vector<4x256xf32>
    %36 = arith.mulf %34, %35 : vector<4x256xf32>
    %c32_29 = arith.constant 32 : index
    %c0_30 = arith.constant 0 : index
    %37 = vector.load %arg11[%c32_29, %c0_30] : memref<36x256xf32, #tpu.memory_space<vmem>>, vector<4x256xf32>
    tpu.vector_store %arg11[%c32_29, %c0_30], %36 {strides = array<i32>} : memref<36x256xf32, #tpu.memory_space<vmem>>, vector<4x256xf32>,
    %c0_31 = arith.constant 0 : index
    %c0_32 = arith.constant 0 : index
    %38 = vector.load %arg2[%c0_31, %c0_32] : memref<4x36xf32, #tpu.memory_space<vmem>>, vector<4x36xf32>
    %c0_33 = arith.constant 0 : index
    %c0_34 = arith.constant 0 : index
    %39 = vector.load %arg11[%c0_33, %c0_34] : memref<36x256xf32, #tpu.memory_space<vmem>>, vector<36x256xf32>
    %cst_35 = arith.constant dense<0.000000e+00> : vector<4x256xf32>
    %40 = tpu.matmul %38, %39, %cst_35 {dimension_numbers = #tpu.dot_dimension_numbers<[1], [0], [0], [1], [0, 0, 1, 1], [], []>} : vector<4x36xf32>, vector<36x256xf32>, vector<4x256xf32> -> vector<4x256xf32>
    %c0_36 = arith.constant 0 : index
    %c0_37 = arith.constant 0 : index
    %41 = vector.load %arg3[%c0_36, %c0_37] : memref<4x1xf32, #tpu.memory_space<vmem>>, vector<4x1xf32>
    %42 = vector.broadcast %41 : vector<4x1xf32> to vector<4x256xf32>
    %43 = arith.addf %40, %42 : vector<4x256xf32>
    %cst_38 = arith.constant 0.000000e+00 : f32
    %44 = vector.broadcast %cst_38 : f32 to vector<4x256xf32>
    %45 = arith.maximumf %43, %44 : vector<4x256xf32>
    %c0_39 = arith.constant 0 : index
    %c32_40 = arith.constant 32 : index
    %46 = vector.load %arg10[%c0_39, %c32_40] : memref<4x320xf32, #tpu.memory_space<vmem>>, vector<4x256xf32>
    tpu.vector_store %arg10[%c0_39, %c32_40], %45 {strides = array<i32>} : memref<4x320xf32, #tpu.memory_space<vmem>>, vector<4x256xf32>,
    %c0_41 = arith.constant 0 : index
    %c15_42 = arith.constant 15 : index
    %47 = vector.load %arg10[%c0_41, %c15_42] : memref<4x320xf32, #tpu.memory_space<vmem>>, vector<4x256xf32>
    %48 = vector.broadcast %0 : vector<1x256xf32> to vector<4x256xf32>
    %49 = arith.mulf %47, %48 : vector<4x256xf32>
    %c0_43 = arith.constant 0 : index
    %c0_44 = arith.constant 0 : index
    %50 = vector.load %arg11[%c0_43, %c0_44] : memref<36x256xf32, #tpu.memory_space<vmem>>, vector<4x256xf32>
    tpu.vector_store %arg11[%c0_43, %c0_44], %49 {strides = array<i32>} : memref<36x256xf32, #tpu.memory_space<vmem>>, vector<4x256xf32>,
    %c0_45 = arith.constant 0 : index
    %c16_46 = arith.constant 16 : index
    %51 = vector.load %arg10[%c0_45, %c16_46] : memref<4x320xf32, #tpu.memory_space<vmem>>, vector<4x256xf32>
    %c4_47 = arith.constant 4 : index
    %c0_48 = arith.constant 0 : index
    %52 = vector.load %arg11[%c4_47, %c0_48] : memref<36x256xf32, #tpu.memory_space<vmem>>, vector<4x256xf32>
    tpu.vector_store %arg11[%c4_47, %c0_48], %51 {strides = array<i32>} : memref<36x256xf32, #tpu.memory_space<vmem>>, vector<4x256xf32>,
    %c0_49 = arith.constant 0 : index
    %c17_50 = arith.constant 17 : index
    %53 = vector.load %arg10[%c0_49, %c17_50] : memref<4x320xf32, #tpu.memory_space<vmem>>, vector<4x256xf32>
    %54 = vector.broadcast %1 : vector<1x256xf32> to vector<4x256xf32>
    %55 = arith.mulf %53, %54 : vector<4x256xf32>
    %c8_51 = arith.constant 8 : index
    %c0_52 = arith.constant 0 : index
    %56 = vector.load %arg11[%c8_51, %c0_52] : memref<36x256xf32, #tpu.memory_space<vmem>>, vector<4x256xf32>
    tpu.vector_store %arg11[%c8_51, %c0_52], %55 {strides = array<i32>} : memref<36x256xf32, #tpu.memory_space<vmem>>, vector<4x256xf32>,
    %c0_53 = arith.constant 0 : index
    %c31_54 = arith.constant 31 : index
    %57 = vector.load %arg10[%c0_53, %c31_54] : memref<4x320xf32, #tpu.memory_space<vmem>>, vector<4x256xf32>
    %58 = vector.broadcast %0 : vector<1x256xf32> to vector<4x256xf32>
    %59 = arith.mulf %57, %58 : vector<4x256xf32>
    %c12_55 = arith.constant 12 : index
    %c0_56 = arith.constant 0 : index
    %60 = vector.load %arg11[%c12_55, %c0_56] : memref<36x256xf32, #tpu.memory_space<vmem>>, vector<4x256xf32>
    tpu.vector_store %arg11[%c12_55, %c0_56], %59 {strides = array<i32>} : memref<36x256xf32, #tpu.memory_space<vmem>>, vector<4x256xf32>,
    %c0_57 = arith.constant 0 : index
    %c32_58 = arith.constant 32 : index
    %61 = vector.load %arg10[%c0_57, %c32_58] : memref<4x320xf32, #tpu.memory_space<vmem>>, vector<4x256xf32>
    %c16_59 = arith.constant 16 : index
    %c0_60 = arith.constant 0 : index
    %62 = vector.load %arg11[%c16_59, %c0_60] : memref<36x256xf32, #tpu.memory_space<vmem>>, vector<4x256xf32>
    tpu.vector_store %arg11[%c16_59, %c0_60], %61 {strides = array<i32>} : memref<36x256xf32, #tpu.memory_space<vmem>>, vector<4x256xf32>,
    %c0_61 = arith.constant 0 : index
    %c33_62 = arith.constant 33 : index
    %63 = vector.load %arg10[%c0_61, %c33_62] : memref<4x320xf32, #tpu.memory_space<vmem>>, vector<4x256xf32>
    %64 = vector.broadcast %1 : vector<1x256xf32> to vector<4x256xf32>
    %65 = arith.mulf %63, %64 : vector<4x256xf32>
    %c20_63 = arith.constant 20 : index
    %c0_64 = arith.constant 0 : index
    %66 = vector.load %arg11[%c20_63, %c0_64] : memref<36x256xf32, #tpu.memory_space<vmem>>, vector<4x256xf32>
    tpu.vector_store %arg11[%c20_63, %c0_64], %65 {strides = array<i32>} : memref<36x256xf32, #tpu.memory_space<vmem>>, vector<4x256xf32>,
    %c0_65 = arith.constant 0 : index
    %c47_66 = arith.constant 47 : index
    %67 = vector.load %arg10[%c0_65, %c47_66] : memref<4x320xf32, #tpu.memory_space<vmem>>, vector<4x256xf32>
    %68 = vector.broadcast %0 : vector<1x256xf32> to vector<4x256xf32>
    %69 = arith.mulf %67, %68 : vector<4x256xf32>
    %c24_67 = arith.constant 24 : index
    %c0_68 = arith.constant 0 : index
    %70 = vector.load %arg11[%c24_67, %c0_68] : memref<36x256xf32, #tpu.memory_space<vmem>>, vector<4x256xf32>
    tpu.vector_store %arg11[%c24_67, %c0_68], %69 {strides = array<i32>} : memref<36x256xf32, #tpu.memory_space<vmem>>, vector<4x256xf32>,
    %c0_69 = arith.constant 0 : index
    %c48_70 = arith.constant 48 : index
    %71 = vector.load %arg10[%c0_69, %c48_70] : memref<4x320xf32, #tpu.memory_space<vmem>>, vector<4x256xf32>
    %c28_71 = arith.constant 28 : index
    %c0_72 = arith.constant 0 : index
    %72 = vector.load %arg11[%c28_71, %c0_72] : memref<36x256xf32, #tpu.memory_space<vmem>>, vector<4x256xf32>
    tpu.vector_store %arg11[%c28_71, %c0_72], %71 {strides = array<i32>} : memref<36x256xf32, #tpu.memory_space<vmem>>, vector<4x256xf32>,
    %c0_73 = arith.constant 0 : index
    %c49_74 = arith.constant 49 : index
    %73 = vector.load %arg10[%c0_73, %c49_74] : memref<4x320xf32, #tpu.memory_space<vmem>>, vector<4x256xf32>
    %74 = vector.broadcast %1 : vector<1x256xf32> to vector<4x256xf32>
    %75 = arith.mulf %73, %74 : vector<4x256xf32>
    %c32_75 = arith.constant 32 : index
    %c0_76 = arith.constant 0 : index
    %76 = vector.load %arg11[%c32_75, %c0_76] : memref<36x256xf32, #tpu.memory_space<vmem>>, vector<4x256xf32>
    tpu.vector_store %arg11[%c32_75, %c0_76], %75 {strides = array<i32>} : memref<36x256xf32, #tpu.memory_space<vmem>>, vector<4x256xf32>,
    %c0_77 = arith.constant 0 : index
    %c0_78 = arith.constant 0 : index
    %77 = vector.load %arg4[%c0_77, %c0_78] : memref<4x36xf32, #tpu.memory_space<vmem>>, vector<4x36xf32>
    %c0_79 = arith.constant 0 : index
    %c0_80 = arith.constant 0 : index
    %78 = vector.load %arg11[%c0_79, %c0_80] : memref<36x256xf32, #tpu.memory_space<vmem>>, vector<36x256xf32>
    %cst_81 = arith.constant dense<0.000000e+00> : vector<4x256xf32>
    %79 = tpu.matmul %77, %78, %cst_81 {dimension_numbers = #tpu.dot_dimension_numbers<[1], [0], [0], [1], [0, 0, 1, 1], [], []>} : vector<4x36xf32>, vector<36x256xf32>, vector<4x256xf32> -> vector<4x256xf32>
    %c0_82 = arith.constant 0 : index
    %c0_83 = arith.constant 0 : index
    %80 = vector.load %arg5[%c0_82, %c0_83] : memref<4x1xf32, #tpu.memory_space<vmem>>, vector<4x1xf32>
    %81 = vector.broadcast %80 : vector<4x1xf32> to vector<4x256xf32>
    %82 = arith.addf %79, %81 : vector<4x256xf32>
    %c0_84 = arith.constant 0 : index
    %c0_85 = arith.constant 0 : index
    %c0_86 = arith.constant 0 : index
    %83 = vector.load %arg6[%c0_84, %c0_85, %c0_86] : memref<1x4x1xf32, #tpu.memory_space<vmem>>, vector<1x4x1xf32>
    %84 = vector.shape_cast %83 : vector<1x4x1xf32> to vector<4x1xf32>
    %85 = vector.broadcast %84 : vector<4x1xf32> to vector<4x256xf32>
    %86 = arith.mulf %85, %82 : vector<4x256xf32>
    %87 = arith.addf %6, %86 : vector<4x256xf32>
    %c0_87 = arith.constant 0 : index
    %c0_88 = arith.constant 0 : index
    %c0_89 = arith.constant 0 : index
    %88 = vector.load %arg7[%c0_87, %c0_88, %c0_89] : memref<1x4x1xf32, #tpu.memory_space<vmem>>, vector<1x4x1xf32>
    %89 = vector.shape_cast %88 : vector<1x4x1xf32> to vector<4x1xf32>
    %90 = vector.broadcast %89 : vector<4x1xf32> to vector<4x256xf32>
    %91 = arith.addf %87, %90 : vector<4x256xf32>
    %c0_90 = arith.constant 0 : index
    %c0_91 = arith.constant 0 : index
    %c0_92 = arith.constant 0 : index
    %92 = vector.load %arg9[%c0_90, %c0_91, %c0_92] : memref<1x4x256xf32, #tpu.memory_space<vmem>>, vector<1x4x256xf32>
    %93 = vector.shape_cast %92 : vector<1x4x256xf32> to vector<4x256xf32>
    %94 = vector.shape_cast %91 : vector<4x256xf32> to vector<1x4x256xf32>
    tpu.vector_store %arg9[%c0_90, %c0_91, %c0_92], %94 {strides = array<i32>} : memref<1x4x256xf32, #tpu.memory_space<vmem>>, vector<1x4x256xf32>,
    return
  }
  func.func @transform_0(%arg0: i32) -> (i32, i32, i32) {
    %c0_i32 = arith.constant 0 : i32
    %c0_i32_0 = arith.constant 0 : i32
    %c0_i32_1 = arith.constant 0 : i32
    return %arg0, %c0_i32, %c0_i32_0 : i32, i32, i32
  }
  func.func @transform_1(%arg0: i32) -> (i32, i32) {
    %c0_i32 = arith.constant 0 : i32
    %c0_i32_0 = arith.constant 0 : i32
    %c0_i32_1 = arith.constant 0 : i32
    return %c0_i32, %c0_i32_0 : i32, i32
  }
  func.func @transform_2(%arg0: i32) -> (i32, i32) {
    %c0_i32 = arith.constant 0 : i32
    %c0_i32_0 = arith.constant 0 : i32
    %c0_i32_1 = arith.constant 0 : i32
    return %c0_i32, %c0_i32_0 : i32, i32
  }
  func.func @transform_3(%arg0: i32) -> (i32, i32) {
    %c0_i32 = arith.constant 0 : i32
    %c0_i32_0 = arith.constant 0 : i32
    %c0_i32_1 = arith.constant 0 : i32
    return %c0_i32, %c0_i32_0 : i32, i32
  }
  func.func @transform_4(%arg0: i32) -> (i32, i32) {
    %c0_i32 = arith.constant 0 : i32
    %c0_i32_0 = arith.constant 0 : i32
    %c0_i32_1 = arith.constant 0 : i32
    return %c0_i32, %c0_i32_0 : i32, i32
  }
  func.func @transform_5(%arg0: i32) -> (i32, i32, i32) {
    %c0_i32 = arith.constant 0 : i32
    %c0_i32_0 = arith.constant 0 : i32
    %c0_i32_1 = arith.constant 0 : i32
    return %arg0, %c0_i32, %c0_i32_0 : i32, i32, i32
  }
  func.func @transform_6(%arg0: i32) -> (i32, i32, i32) {
    %c0_i32 = arith.constant 0 : i32
    %c0_i32_0 = arith.constant 0 : i32
    %c0_i32_1 = arith.constant 0 : i32
    return %arg0, %c0_i32, %c0_i32_0 : i32, i32, i32
  }
  func.func @transform_7(%arg0: i32) -> (i32, i32) {
    %c0_i32 = arith.constant 0 : i32
    %c0_i32_0 = arith.constant 0 : i32
    %c0_i32_1 = arith.constant 0 : i32
    return %c0_i32, %c0_i32_0 : i32, i32
  }
  func.func @transform_8(%arg0: i32) -> (i32, i32, i32) {
    %c0_i32 = arith.constant 0 : i32
    %c0_i32_0 = arith.constant 0 : i32
    %c0_i32_1 = arith.constant 0 : i32
    return %arg0, %c0_i32, %c0_i32_0 : i32, i32, i32
  }
}

</mosaic_0001>

<bundles_post_ra>
// kernel: tpu_custom_call.1
= control target key start
LH: loop header
LB: loop body
LE: loop exit
PB: predicated region body
PF: predicated region fallthrough
CT: control target
= control target key end

     0   :  { %13 = vsyncpa [#allocation5], 0  ;;  %s1656_s0 = inlined_call_operand.vmem [shape: f32[2,4,256], index: 0, kind: input, shape index: {}]   ;;  %s1657_s1 = inlined_call_operand.vmem [shape: f32[4,36], index: 1, kind: input, shape index: {}]   ;;  %s1658_s2 = inlined_call_operand.vmem [shape: f32[4,1], index: 2, kind: input, shape index: {}]   ;;  %s1659_s3 = inlined_call_operand.vmem [shape: f32[4,36], index: 3, kind: input, shape index: {}]   ;;  %s1660_s4 = inlined_call_operand.vmem [shape: f32[4,1], index: 4, kind: input, shape index: {}]   ;;  %s1661_s5 = inlined_call_operand.vmem [shape: f32[2,4,1], index: 5, kind: input, shape index: {}]   ;;  %s1662_s6 = inlined_call_operand.vmem [shape: f32[2,4,1], index: 6, kind: input, shape index: {}]   ;;  %s1663_s7 = inlined_call_operand.vmem [shape: f32[2,256], index: 7, kind: input, shape index: {}]   ;;  %s1664_s8 = inlined_call_operand.hbm [shape: f32[2,4,256], index: 8, kind: output, shape index: {}]  }
   0x1   :  { %15 = vsyncpa [#allocation5 + $0x1], 0  ;;  %s1339_s27 = smov 0   ;;  %s1341_s28 = smov 0  }
   0x2   :  { %s1343_s29 = smov 0   ;;  %s1345_s30 = smov 0  }
   0x3 LB: > { %s1360_s9 = sadd.s32 4294967295, %s1272_s30   ;;  %s1103_s10 = sadd.s32 4294967294, %s1272_s30   ;;  %s1272_s30 = sphi %s1345_s30, %s1672_s30   ;;  %s1268_s29 = sphi %s1343_s29, %s1671_s29   ;;  %s1264_s28 = sphi %s1341_s28, %s1670_s28   ;;  %s1260_s27 = sphi %s1339_s27, %s1669_s27  }
   0x4   : > { %s1364_s11 = sadd.s32 1, %s1272_s30   ;;  %s211_s12 = sadd.s32 1, %s1268_s29 }
   0x5   : > { %s208_s13 = ssub.s32 %s1272_s30, %s1364_s11  ;;  %p221_p0 = scmp.ne.s32.totalorder %s1268_s29, %s1264_s28 }
   0x6   : > { %p209_p1 = scmp.eq.s32.totalorder %s208_s13, 0  ;;  %p222_p2 = scmp.eq.s32.totalorder %s1360_s9, 1 }
   0x7   : > { %p227_p3 = scmp.ne.s32.totalorder %s1264_s28, %s1260_s27  ;;  %p228_p4 = scmp.eq.s32.totalorder %s1103_s10, 1 }
   0x8   : > { %s1375_s14 = scalar_select %p209_p1, %s1268_s29, %s211_s12  }
   0x9   : > { %p1377_p5 = por %p222_p2, %p221_p0  ;;  %p1381_p6 = por %p228_p4, %p227_p3 }
   0xa   : > { %p1106_p7 = scmp.ge.s32.totalorder %s1272_s30, 1  ;;  %p283_p8 = scmp.lt.s32.totalorder %s1272_s30, 3 }
   0xc   : > { %p284_p9 = pnand %p1106_p7, %p283_p8 }
   0xd   : > { %p325_p10 = scmp.lt.s32.totalorder (!%p284_p9), %s1360_s9, 1  ;;  %v362_v0 = vlaneseq (!%p284_p9)  ;;  %vm341_vm0 = vcmask (!%p284_p9), 257024   ;;  %v1274_v2 = vmov (!%p284_p9), 0.0   ;;  %vm343_vm1 = vcmask (!%p284_p9), 519424   ;;  %s1275_s26 = smov (!%p284_p9), 32  }
   0xe   : > { %287 = sbr.rel (%p284_p9) target bundleno = 1088 (0x440), region = 52  ;;  %342 = vst.msk [vmem:[#allocation2] sm:$0xf] (!%p284_p9), %vm341_vm0, %v1274_v2  ;;  %691 = vmatprep.mubr.f32.mxu0 (!%p284_p9), %v1274_v2  ;;  %970 = vmatprep.mubr.f32.mxu1 (!%p284_p9), %v1274_v2  ;;  %v1112_v3 = vld [vmem:[%s1663_s7 + $0x1] ss:$2 sm:$0x3] (!%p284_p9) }
   0xf   : > { %v1391_v1 = vshrl.u32 (!%p284_p9), %v362_v0, 7  ;;  %v338_v4 = vld [vmem:[%s1663_s7] ss:$2 sm:$0x3] (!%p284_p9)  ;;  %344 = vst.msk [vmem:[#allocation2 + $0x8] sm:$0xf] (!%p284_p9), %vm343_vm1, %v1274_v2 }
  0x10   : > { %s1276_s10 = smov (!%p284_p9), 17   ;;  %s1277_s12 = smov (!%p284_p9), 15   ;;  %vm354_vm2 = vcmask (!%p284_p9), 1043712   ;;  %vm355_vm3 = vcmask (!%p284_p9), 1047556   ;;  %vm350_vm4 = vcmask (!%p284_p9), 261120   ;;  %vm457_vm6 = vcmask (!%p284_p9), 252928  }
  0x11   : > { %v364_v5 = vsub.s32 (!%p284_p9), 0, %v1391_v1  ;;  %v368_v6 = vsub.s32 (!%p284_p9), 1, %v1391_v1  ;;  %s1278_s13 = smov (!%p284_p9), 31   ;;  %s1279_s18 = smov (!%p284_p9), 47   ;;  %vm1410_vm5 = vmor (!%p284_p9), %vm355_vm3, %vm354_vm2  ;;  %vm374_vm7 = vcmask (!%p284_p9), 121856   ;;  %vm430_vm8 = vcmask (!%p284_p9), 138240  }
  0x12   : > { %s1280_s19 = smov (!%p284_p9), 33   ;;  %s1281_s20 = smov (!%p284_p9), 49   ;;  %vm503_vm9 = vcmask (!%p284_p9), 269312   ;;  %vm531_vm10 = vcmask (!%p284_p9), 384000   ;;  %vm577_vm11 = vcmask (!%p284_p9), 400384   ;;  %vm408_vm12 = vcmask (!%p284_p9), 916480  }
  0x13   : > { %v421_v8 = vrot.slane (!%p284_p9), %v1112_v3, %v364_v5  ;;  %v425_v9 = vrot.slane (!%p284_p9), %v1112_v3, %v368_v6  ;;  %v365_v10 = vrot.slane (!%p284_p9), %v338_v4, %v364_v5  ;;  %v369_v11 = vrot.slane (!%p284_p9), %v338_v4, %v368_v6  ;;  %s1282_s21 = smov (!%p284_p9), 96   ;;  %s1284_s23 = smov (!%p284_p9), 113   ;;  %v610_v5 = vld [vmem:[%s1658_s2] sm:$0xf] (!%p284_p9) }
  0x14   : > { %s1285_s24 = smov (!%p284_p9), 80   ;;  %v1291_v6 = vmov (!%p284_p9), 0   ;;  %vm565_vm13 = vcmask (!%p284_p9), 654336   ;;  %vm491_vm14 = vcmask (!%p284_p9), 785408   ;;  %vm473_vm15 = vcmask (!%p284_p9), 793600  }
  0x15   : > { %s1389_s17 = scalar_select %p325_p10, %s1360_s9, 1  ;;  %v426_v12 = vcombine.low %v421_v8, %v425_v9  ;;  %v370_v13 = vcombine.low %v365_v10, %v369_v11  ;;  %1200 = vset.pattern.permute.xlu0 %v1291_v6  ;;  %1201 = vset.pattern.permute.xlu1 %v1291_v6  ;;  %vm519_vm1 = vcmask 777216   ;;  %vm389_vm2 = vcmask 924672  }
  0x16   : > { %vm445_vm3 = vcmask 908288  }
  0x17   : > { %s1124_s22 = sshll.u32 %s1389_s17, 3  ;;  %427 = vrot.lane.b32.xlu1 %v426_v12, %s1276_s10  ;;  %s1287_s10 = smov 97  }
  0x18   : > { %s329_s25 = scalar_lea.vmem %s1656_s0, %s1124_s22  ;;  %s1283_s22 = smov 112  }
  0x19   : > { %v1406_v7 = vld [vmem:[%s329_s25] sm:$0xff]  ;;  %s1286_s25 = smov 111  }
  0x1a   : > { %347 = vrot.lane.b32.xlu0 %v1406_v7, %s1275_s26 }
  0x1b   : > { %454 = vrot.lane.b32.xlu1 %v370_v13, %s1278_s13  ;;  %s1289_s13 = smov 95  }
  0x1e   : > { %371 = vrot.lane.b32.xlu0 %v370_v13, %s1277_s12  ;;  %s1288_s12 = smov 81  }
  0x1f   : > { %500 = vrot.lane.b32.xlu1 %v426_v12, %s1280_s19  ;;  %s322_s19 = sand.u32 1, %s1264_s28  }
  0x22   : > { %528 = vrot.lane.b32.xlu0 %v370_v13, %s1279_s18  ;;  %s1290_s18 = smov 79  }
  0x26   : > { %574 = vrot.lane.b32.xlu0 %v426_v12, %s1281_s20  ;;  %s1107_s20 = sshll.u32 %s322_s19, 3 }
  0x89   : > { %v428_v18 = vpop.permute.xlu1 %427 }
  0x8a   : > { %v1431_v27 = vrot.slane %v428_v18, 4 }
  0x8c   : > { %v348_v14 = vpop.permute.xlu0 %347  ;;  %v1453_v39 = vsel %vm430_vm8, %v1431_v27, %v428_v18  ;;  %vm620_vm8 = vcmask 1043456  }
  0x8d   : > { %v349_v16 = vrot.slane %v348_v14, 4  ;;  %v455_v24 = vpop.permute.xlu1 %454 }
  0x8e   : > { %v1426_v26 = vrot.slane %v455_v24, 4 }
  0x8f   : > { %v351_v17 = vsel %vm350_vm4, %v349_v16, %v348_v14  ;;  %358 = vst.msk [vmem:[#allocation2 + $0x8] sm:$0xf] %vm341_vm0, %v349_v16 }
  0x90   : > { %357 = vst.msk [vmem:[#allocation2] sm:$0xff] %vm1410_vm5, %v351_v17  ;;  %v372_v19 = vpop.permute.xlu0 %371  ;;  %v1434_v31 = vsel %vm457_vm6, %v1426_v26, %v455_v24  ;;  %vm546_vm6 = vcmask 662528  }
  0x91   : > { %v1418_v20 = vrot.slane %v372_v19, 4  ;;  %v501_v40 = vpop.permute.xlu1 %500 }
  0x92   : > { %v1459_v44 = vrot.slane %v501_v40, 4 }
  0x93   : > { %v1445_v36 = vsel %vm374_vm7, %v1418_v20, %v372_v19  ;;  %vm592_vm7 = vcmask 646144  }
  0x94   : > { %v529_v29 = vpop.permute.xlu0 %528  ;;  %v1469_v48 = vsel %vm503_vm9, %v1459_v44, %v501_v40  ;;  %vm616_vm9 = vcmask 293888  }
  0x95   : > { %v1439_v32 = vrot.slane %v529_v29, 4 }
  0x96   : > { %v481_v21 = vld [vmem:[#allocation2 + $0x8] sm:$0xf] }
  0x97   : > { %v360_v22 = vld [vmem:[#allocation2 + $0x8] sm:$0xf]  ;;  %v1420_v23 = vld [vmem:[#allocation2] sm:$0xff]  ;;  %489 = vrot.lane.b32.xlu0 %v481_v21, %s1282_s21  ;;  %v1477_v53 = vsel %vm531_vm10, %v1439_v32, %v529_v29 }
  0x98   : > { %404 = vrot.lane.b32.xlu1 %v1420_v23, %s1283_s22  ;;  %v379_v25 = vmul.f32 %v1418_v20, %v360_v22  ;;  %v1202_v28 = vld [vmem:[#allocation2 + $0x8] ss:$0 sps:$4 sm:$0xff]   ;;  %v461_v34 = vmul.f32 %v1434_v31, %v1420_v23  ;;  %v378_v38 = vmul.f32 %v1420_v23, %v1445_v36  ;;  %v434_v42 = vmul.f32 %v1453_v39, %v1420_v23  ;;  %v575_v56 = vpop.permute.xlu0 %574 }
  0x99   : > { %v416_v30 = vld [vmem:[#allocation2 + $0x8] sm:$0xf]  ;;  %v400_v45 = vcombine.low %v1420_v23, %v1420_v23  ;;  %v484_v47 = vcombine.high %v1420_v23, %v1420_v23  ;;  %v507_v52 = vmul.f32 %v1469_v48, %v1420_v23  ;;  %v535_v55 = vmul.f32 %v1477_v53, %v1420_v23 }
  0x9a   : > { %v435_v33 = vmul.f32 %v1431_v27, %v416_v30  ;;  %v527_v35 = vld [vmem:[#allocation2 + $0x8] sm:$0xf]  ;;  %v465_v57 = vcombine.low %v461_v34, %v461_v34  ;;  %v382_v58 = vcombine.high %v378_v38, %v378_v38  ;;  %v1485_v59 = vrot.slane %v575_v56, 4 }
  0x9b   : > { %387 = vrot.lane.b32.xlu0 %v379_v25, %s1284_s23  ;;  %v536_v37 = vmul.f32 %v1439_v32, %v527_v35  ;;  %v1203_v41 = vld [vmem:[#allocation2 + $0x8] ss:$0 sps:$4 sm:$0xff]   ;;  %v511_v60 = vcombine.low %v507_v52, %v507_v52  ;;  %v438_v61 = vcombine.high %v434_v42, %v434_v42  ;;  %v539_v0 = vcombine.high %v535_v55, %v535_v55 }
  0x9c   : > { %561 = vrot.lane.b32.xlu1 %v1420_v23, %s1285_s24  ;;  %v453_v43 = vld [vmem:[#allocation2 + $0x8] sm:$0xf]  ;;  %v1490_v62 = vsel %vm577_vm11, %v1485_v59, %v575_v56 }
  0x9d   : > { %v462_v46 = vmul.f32 %v1426_v26, %v453_v43  ;;  %v499_v49 = vld [vmem:[#allocation2 + $0x8] sm:$0xf]  ;;  %v581_v63 = vmul.f32 %v1490_v62, %v1420_v23 }
  0x9e   : > { %v508_v51 = vmul.f32 %v1459_v44, %v499_v49  ;;  %v573_v2 = vld [vmem:[#allocation2 + $0x8] sm:$0xf] }
  0x9f   : > { %406 = vrot.lane.b32.xlu0 %v1202_v28, %s1283_s22  ;;  %v466_v50 = vcombine.low %v462_v46, %v462_v46  ;;  %v582_v3 = vmul.f32 %v1485_v59, %v573_v2  ;;  %v585_v4 = vcombine.high %v581_v63, %v581_v63 }
  0xa0   : > { %485 = vrot.lane.b32.xlu1 %v1420_v23, %s1282_s21  ;;  %v512_v54 = vcombine.low %v508_v51, %v508_v51 }
  0xa3   : > { %443 = vrot.lane.b32.xlu0 %v435_v33, %s1286_s25 }
  0xa4   : > { %469 = vrot.lane.b32.xlu1 %v461_v34, %s1287_s10 }
  0xa7   : > { %544 = vrot.lane.b32.xlu0 %v536_v37, %s1288_s12 }
  0xa8   : > { %383 = vrot.lane.b32.xlu1 %v378_v38, %s1284_s23 }
  0xab   : > { %563 = vrot.lane.b32.xlu0 %v1203_v41, %s1285_s24 }
  0xac   : > { %439 = vrot.lane.b32.xlu1 %v434_v42, %s1286_s25 }
  0xaf   : > { %402 = vrot.lane.b32.xlu0 %v400_v45, %s1283_s22 }
  0xb0   : > { %487 = vrot.lane.b32.xlu1 %v484_v47, %s1282_s21 }
  0xb3   : > { %471 = vrot.lane.b32.xlu0 %v466_v50, %s1287_s10 }
  0xb4   : > { %515 = vrot.lane.b32.xlu1 %v507_v52, %s1289_s13 }
  0xb7   : > { %517 = vrot.lane.b32.xlu0 %v512_v54, %s1289_s13 }
  0xb8   : > { %540 = vrot.lane.b32.xlu1 %v535_v55, %s1288_s12 }
  0xbb   : > { %467 = vrot.lane.b32.xlu0 %v465_v57, %s1287_s10 }
  0xbc   : > { %385 = vrot.lane.b32.xlu1 %v382_v58, %s1284_s23 }
  0xbf   : > { %513 = vrot.lane.b32.xlu0 %v511_v60, %s1289_s13 }
  0xc0   : > { %441 = vrot.lane.b32.xlu1 %v438_v61, %s1286_s25 }
  0xc3   : > { %559 = vrot.lane.b32.xlu0 %v400_v45, %s1285_s24 }
  0xc4   : > { %542 = vrot.lane.b32.xlu1 %v539_v0, %s1288_s12 }
  0xc7   : > { %590 = vrot.lane.b32.xlu0 %v582_v3, %s1290_s18 }
  0xc8   : > { %588 = vrot.lane.b32.xlu1 %v585_v4, %s1290_s18 }
  0xcb   : > { %613 = vperm.xlu0 %1200, %v610_v5  }
  0xcc   : > { %586 = vrot.lane.b32.xlu1 %v581_v63, %s1290_s18 }
 0x109   : > { %v490_v8 = vpop.permute.xlu0 %489 }
 0x10a   : > { %v405_v9 = vpop.permute.xlu1 %404 }
 0x10d   : > { %v388_v10 = vpop.permute.xlu0 %387 }
 0x10e   : > { %v562_v11 = vpop.permute.xlu1 %561 }
 0x111   : > { %v407_v12 = vpop.permute.xlu0 %406 }
 0x112   : > { %v410_v13 = vsel %vm408_vm12, %v405_v9, %v407_v12  ;;  %v486_v14 = vpop.permute.xlu1 %485 }
 0x113   : > { %414 = vst [vmem:[#allocation3 + $0x8] sm:$0xf0] %v410_v13 }
 0x115   : > { %v444_v16 = vpop.permute.xlu0 %443 }
 0x116   : > { %v470_v17 = vpop.permute.xlu1 %469 }
 0x119   : > { %v545_v18 = vpop.permute.xlu0 %544 }
 0x11a   : > { %v384_v19 = vpop.permute.xlu1 %383 }
 0x11d   : > { %v564_v21 = vpop.permute.xlu0 %563 }
 0x11e   : > { %v567_v22 = vsel %vm565_vm13, %v562_v11, %v564_v21  ;;  %v440_v23 = vpop.permute.xlu1 %439 }
 0x11f   : > { %571 = vst [vmem:[#allocation3 + $0x38] sm:$0xf0] %v567_v22 }
 0x121   : > { %v403_v24 = vpop.permute.xlu0 %402 }
 0x122   : > { %v409_v25 = vsel %vm408_vm12, %v403_v24, %v405_v9  ;;  %v488_v28 = vpop.permute.xlu1 %487 }
 0x123   : > { %413 = vst [vmem:[#allocation3] sm:$0xf0] %v409_v25  ;;  %v492_v29 = vsel %vm491_vm14, %v486_v14, %v488_v28  ;;  %v493_v30 = vsel %vm491_vm14, %v488_v28, %v490_v8 }
 0x124   : > { %496 = vst [vmem:[#allocation3 + $0x20] sm:$0xf] %v492_v29  ;;  %497 = vst [vmem:[#allocation3 + $0x28] sm:$0xf] %v493_v30 }
 0x125   : > { %v472_v33 = vpop.permute.xlu0 %471 }
 0x126   : > { %v475_v34 = vsel %vm473_vm15, %v470_v17, %v472_v33  ;;  %v516_v35 = vpop.permute.xlu1 %515 }
 0x127   : > { %479 = vst [vmem:[#allocation3 + $0x18] sm:$0xf0] %v475_v34 }
 0x129   : > { %v518_v37 = vpop.permute.xlu0 %517 }
 0x12a   : > { %v521_v38 = vsel %vm519_vm1, %v516_v35, %v518_v37  ;;  %v541_v40 = vpop.permute.xlu1 %540 }
 0x12b   : > { %525 = vst [vmem:[#allocation3 + $0x28] sm:$0xf0] %v521_v38 }
 0x12d   : > { %v468_v41 = vpop.permute.xlu0 %467 }
 0x12e   : > { %v474_v42 = vsel %vm473_vm15, %v468_v41, %v470_v17  ;;  %v386_v43 = vpop.permute.xlu1 %385 }
 0x12f   : > { %478 = vst [vmem:[#allocation3 + $0x10] sm:$0xf0] %v474_v42  ;;  %v390_v45 = vsel %vm389_vm2, %v384_v19, %v386_v43  ;;  %v391_v46 = vsel %vm389_vm2, %v386_v43, %v388_v10 }
 0x130   : > { %394 = vst [vmem:[#allocation3] sm:$0xf] %v390_v45  ;;  %395 = vst [vmem:[#allocation3 + $0x8] sm:$0xf] %v391_v46 }
 0x131   : > { %v514_v47 = vpop.permute.xlu0 %513 }
 0x132   : > { %v520_v49 = vsel %vm519_vm1, %v514_v47, %v516_v35  ;;  %v442_v50 = vpop.permute.xlu1 %441  ;;  %v605_v9 = vld [vmem:[#allocation3 + $0x28] sm:$0xff] }
 0x133   : > { %524 = vst [vmem:[#allocation3 + $0x20] sm:$0xf0] %v520_v49  ;;  %v446_v51 = vsel %vm445_vm3, %v440_v23, %v442_v50  ;;  %v447_v52 = vsel %vm445_vm3, %v442_v50, %v444_v16 }
 0x134   : > { %450 = vst [vmem:[#allocation3 + $0x10] sm:$0xf] %v446_v51  ;;  %451 = vst [vmem:[#allocation3 + $0x18] sm:$0xf] %v447_v52 }
 0x135   : > { %v560_v54 = vpop.permute.xlu0 %559 }
 0x136   : > { %v566_v55 = vsel %vm565_vm13, %v560_v54, %v562_v11  ;;  %v543_v56 = vpop.permute.xlu1 %542 }
 0x137   : > { %570 = vst [vmem:[#allocation3 + $0x30] sm:$0xf0] %v566_v55  ;;  %v547_v57 = vsel %vm546_vm6, %v541_v40, %v543_v56  ;;  %v548_v58 = vsel %vm546_vm6, %v543_v56, %v545_v18  ;;  %v601_v63 = vld [vmem:[#allocation3 + $0x8] sm:$0xff]  ;;  %v600_v3 = vld [vmem:[#allocation3] sm:$0xff]  ;;  %v599_v18 = vld [vmem:[%s1657_s1] sm:$0xf] }
 0x138   : > { %551 = vst [vmem:[#allocation3 + $0x30] sm:$0xf] %v547_v57  ;;  %552 = vst [vmem:[#allocation3 + $0x38] sm:$0xf] %v548_v58 }
 0x139   : > { %v591_v60 = vpop.permute.xlu0 %590 }
 0x13a   : > { %v589_v61 = vpop.permute.xlu1 %588  ;;  %v604_v12 = vld [vmem:[#allocation3 + $0x20] sm:$0xff] }
 0x13b   : > { %v594_v0 = vsel %vm592_vm7, %v589_v61, %v591_v60  ;;  %v603_v2 = vld [vmem:[#allocation3 + $0x18] sm:$0xff]  ;;  %v602_v4 = vld [vmem:[#allocation3 + $0x10] sm:$0xff] }
 0x13c   : > { %598 = vst [vmem:[#allocation3 + $0x48] sm:$0xf] %v594_v0  ;;  %v1126_v5 = vpack.c.bf16 %v603_v2, %v601_v63  ;;  %v1128_v6 = vpack.c.bf16 %v602_v4, %v600_v3  ;;  %v891_v0 = vld [vmem:[%s1660_s4] sm:$0xf] }
 0x13e   : > { %v587_v8 = vpop.permute.xlu1 %586  ;;  %1127 = vmatprep.subr.bf16.mxu0 %v1126_v5 }
 0x13f   : > { %v593_v10 = vsel %vm592_vm7, %v587_v8, %v589_v61  ;;  %1129 = vmatpush1.bf16.msra.mxu0 %v1128_v6  ;;  %v607_v11 = vld [vmem:[#allocation3 + $0x38] sm:$0xff]  ;;  %v606_v13 = vld [vmem:[#allocation3 + $0x30] sm:$0xff] }
 0x140   : > { %597 = vst [vmem:[#allocation3 + $0x40] sm:$0xf] %v593_v10  ;;  %v1130_v14 = vpack.c.bf16 %v607_v11, %v605_v9  ;;  %v1132_v16 = vpack.c.bf16 %v606_v13, %v604_v12 }
 0x142   : > { %1131 = vmatprep.subr.bf16.mxu0 %v1130_v14 }
 0x143   : > { %1133 = vmatpush1.bf16.msra.mxu0 %v1132_v16  ;;  %v609_v17 = vld [vmem:[#allocation3 + $0x48] sm:$0xf] }
 0x144   : > { %1113 = vmatprep.subr.msk.mxu0 %vm620_vm8, %v609_v17 }
 0x147   : > { %v608_v19 = vld [vmem:[#allocation3 + $0x40] sm:$0xf] }
 0x148   : > { %1114 = vmatpush1.msk.msra.mxu0 %vm620_vm8, %v608_v19 }
 0x149   : > { %1115 = vmatmul.mubr.msk.f32.vlgmr.msra.gmra.mrb[0].mxu0 %vm616_vm9, %v599_v18 }
 0x14a   : > { %v614_v21 = vpop.permute.xlu0 %613 }
 0x21c   : > { %v693_v22 = vpop.f32.mrb[0].mxu0 }
 0x21d   : > { %v694_v23 = vadd.f32 %v693_v22, %v614_v21  ;;  %v695_v24 = vpop.f32.mrb[1].mxu0 }
 0x21e   : > { %v696_v25 = vadd.f32 %v695_v24, %v614_v21 }
 0x21f   : > { %v698_v28 = vmax.f32 %v694_v23, 0.0 }
 0x220   : > { %v699_v29 = vmax.f32 %v696_v25, 0.0 }
 0x222   : > { %v702_v30 = vcombine.low %v698_v28, %v699_v29 }
 0x224   : > { %703 = vrot.lane.b32.xlu1 %v702_v30, %s1275_s26  ;;  %s1110_s26 = sshll.u32 %s1389_s17, 2 }
 0x225   : > { %s333_s17 = scalar_lea.vmem %s1661_s5, %s1110_s26 }
 0x296   : > { %v704_v33 = vpop.permute.xlu1 %703 }
 0x297   : > { %v705_v34 = vrot.slane %v704_v33, 4 }
 0x299   : > { %v706_v35 = vsel %vm350_vm4, %v705_v34, %v704_v33  ;;  %710 = vst.msk [vmem:[#allocation2 + $0x8] sm:$0xf] %vm341_vm0, %v705_v34 }
 0x29a   : > { %709 = vst.msk [vmem:[#allocation2] sm:$0xff] %vm1410_vm5, %v706_v35 }
 0x2a0   : > { %v788_v37 = vld [vmem:[#allocation2 + $0x8] sm:$0xf] }
 0x2a1   : > { %v712_v38 = vld [vmem:[#allocation2 + $0x8] sm:$0xf]  ;;  %796 = vrot.lane.b32.xlu0 %v788_v37, %s1282_s21  ;;  %v730_v40 = vld [vmem:[#allocation2] sm:$0xff] }
 0x2a2   : > { %738 = vrot.lane.b32.xlu1 %v730_v40, %s1283_s22  ;;  %v714_v41 = vmul.f32 %v712_v38, %v1418_v20  ;;  %v1207_v42 = vld [vmem:[#allocation2 + $0x8] ss:$0 sps:$4 sm:$0xff]   ;;  %v769_v45 = vmul.f32 %v730_v40, %v1434_v31  ;;  %v713_v47 = vmul.f32 %v730_v40, %v1445_v36  ;;  %v750_v50 = vmul.f32 %v730_v40, %v1453_v39 }
 0x2a3   : > { %v749_v43 = vld [vmem:[#allocation2 + $0x8] sm:$0xf]  ;;  %v791_v52 = vcombine.high %v730_v40, %v730_v40  ;;  %v806_v55 = vmul.f32 %v730_v40, %v1469_v48  ;;  %v826_v56 = vmul.f32 %v730_v40, %v1477_v53  ;;  %v863_v53 = vmul.f32 %v730_v40, %v1490_v62 }
 0x2a4   : > { %v751_v15 = vmul.f32 %v749_v43, %v1431_v27  ;;  %v825_v46 = vld [vmem:[#allocation2 + $0x8] sm:$0xf]  ;;  %v734_v27 = vcombine.low %v730_v40, %v730_v40  ;;  %v717_v57 = vcombine.high %v713_v47, %v713_v47  ;;  %v754_v48 = vcombine.high %v750_v50, %v750_v50 }
 0x2a5   : > { %722 = vrot.lane.b32.xlu0 %v714_v41, %s1284_s23  ;;  %v827_v20 = vmul.f32 %v825_v46, %v1439_v32  ;;  %v1209_v49 = vld [vmem:[#allocation2 + $0x8] ss:$0 sps:$4 sm:$0xff]   ;;  %v830_v58 = vcombine.high %v826_v56, %v826_v56  ;;  %v867_v63 = vcombine.high %v863_v53, %v863_v53 }
 0x2a6   : > { %851 = vrot.lane.b32.xlu1 %v730_v40, %s1285_s24  ;;  %v768_v51 = vld [vmem:[#allocation2 + $0x8] sm:$0xf] }
 0x2a7   : > { %v770_v31 = vmul.f32 %v768_v51, %v1426_v26  ;;  %v805_v54 = vld [vmem:[#allocation2 + $0x8] sm:$0xf]  ;;  %v773_v26 = vcombine.low %v769_v45, %v769_v45 }
 0x2a8   : > { %v807_v36 = vmul.f32 %v805_v54, %v1459_v44  ;;  %v810_v44 = vcombine.low %v806_v55, %v806_v55  ;;  %v862_v60 = vld [vmem:[#allocation2 + $0x8] sm:$0xf] }
 0x2a9   : > { %740 = vrot.lane.b32.xlu0 %v1207_v42, %s1283_s22  ;;  %v774_v32 = vcombine.low %v770_v31, %v770_v31  ;;  %v864_v61 = vmul.f32 %v862_v60, %v1485_v59  ;;  %v977_v59 = vld [vmem:[%s333_s17] sm:$0xf] }
 0x2aa   : > { %792 = vrot.lane.b32.xlu1 %v730_v40, %s1282_s21  ;;  %v811_v39 = vcombine.low %v807_v36, %v807_v36 }
 0x2ad   : > { %759 = vrot.lane.b32.xlu0 %v751_v15, %s1286_s25 }
 0x2ae   : > { %777 = vrot.lane.b32.xlu1 %v769_v45, %s1287_s10 }
 0x2b1   : > { %835 = vrot.lane.b32.xlu0 %v827_v20, %s1288_s12 }
 0x2b2   : > { %718 = vrot.lane.b32.xlu1 %v713_v47, %s1284_s23 }
 0x2b5   : > { %853 = vrot.lane.b32.xlu0 %v1209_v49, %s1285_s24 }
 0x2b6   : > { %755 = vrot.lane.b32.xlu1 %v750_v50, %s1286_s25 }
 0x2b9   : > { %736 = vrot.lane.b32.xlu0 %v734_v27, %s1283_s22 }
 0x2ba   : > { %794 = vrot.lane.b32.xlu1 %v791_v52, %s1282_s21  ;;  %s324_s21 = scalar_lea.vmem [#allocation4], %s1107_s20 }
 0x2bb   : > { %s1020_s22 = sshll.u32 %s324_s21, 4  ;;  %s1616_s22 = int_to_ptr.vmem [resolvable:$true] %s1020_s22 }
 0x2bd   : > { %779 = vrot.lane.b32.xlu0 %v774_v32, %s1287_s10 }
 0x2be   : > { %814 = vrot.lane.b32.xlu1 %v806_v55, %s1289_s13 }
 0x2c1   : > { %816 = vrot.lane.b32.xlu0 %v811_v39, %s1289_s13 }
 0x2c2   : > { %831 = vrot.lane.b32.xlu1 %v826_v56, %s1288_s12 }
 0x2c5   : > { %775 = vrot.lane.b32.xlu0 %v773_v26, %s1287_s10  ;;  %s337_s10 = scalar_lea.vmem %s1662_s6, %s1110_s26  ;;  %s1125_s26 = sshll.u32 %s1360_s9, 7 }
 0x2c6   : > { %720 = vrot.lane.b32.xlu1 %v717_v57, %s1284_s23  ;;  %v990_v62 = vld [vmem:[%s337_s10] sm:$0xf]  ;;  %s1614_s10 = scalar_lea.hbm %s1664_s8, %s1125_s26  ;;  %s1293_s9 = smov [#allocation4]  }
 0x2c7   : > { %s1214_s17 = sshll.u32 %s1293_s9, 4  ;;  %s1215_s17 = int_to_ptr.vmem [resolvable:$false] %s1214_s17 }
 0x2c8   : > { %p1217_p0 = scmp.lt.s32.totalorder %s1616_s22, %s1215_s17 }
 0x2c9   : > { %812 = vrot.lane.b32.xlu0 %v810_v44, %s1289_s13  ;;  %s1216_s13 = scalar_lea.vmem %s1215_s17, 256 }
 0x2ca   : > { %757 = vrot.lane.b32.xlu1 %v754_v48, %s1286_s25 }
 0x2cd   : > { %849 = vrot.lane.b32.xlu0 %v734_v27, %s1285_s24  ;;  %s1006_s24 = scalar_lea.sflag [#allocation5], %s322_s19 }
 0x2ce   : > { %833 = vrot.lane.b32.xlu1 %v830_v58, %s1288_s12  ;;  %s1210_s12 = scalar_lea.vmem %s1616_s22, 128 }
 0x2cf   : > { %p1211_p11 = scmp.ne.s32.totalorder %s1616_s22, %s1210_s12  ;;  %p1218_p1 = scmp.lt.s32.totalorder %s1216_s13, %s1210_s12 }
 0x2d1   : > { %872 = vrot.lane.b32.xlu0 %v864_v61, %s1290_s18  ;;  %p1212_p12 = pnand %p1211_p11, %p1377_p5  ;;  %p1219_p2 = por %p1218_p1, %p1217_p0 }
 0x2d2   : > { %870 = vrot.lane.b32.xlu1 %v867_v63, %s1290_s18  ;;  %v880_v63 = vld [vmem:[%s1659_s3] sm:$0xf] }
 0x2d3   : > { %p1213_p13 = pneg %p1212_p12 }
 0x2d5   : > { %894 = vperm.xlu0 %1200, %v891_v0   ;;  %p1220_p3 = pnand %p1219_p2, %p1213_p13 }
 0x2d6   : > { %868 = vrot.lane.b32.xlu1 %v863_v53, %s1290_s18 }
 0x2d9   : > { %993 = vperm.xlu0 %1200, %v990_v62   ;;  %v1292_v62 = vmov 839922192  }
 0x2da   : > { %980 = vperm.xlu1 %1201, %v977_v59   ;;  %v996_v59 = vunpack.c.l.s4 %v1292_v62 }
 0x313   : > { %v797_v2 = vpop.permute.xlu0 %796 }
 0x314   : > { %v739_v3 = vpop.permute.xlu1 %738 }
 0x317   : > { %v723_v4 = vpop.permute.xlu0 %722 }
 0x318   : > { %v852_v5 = vpop.permute.xlu1 %851 }
 0x31b   : > { %v741_v6 = vpop.permute.xlu0 %740 }
 0x31c   : > { %v743_v8 = vsel %vm408_vm12, %v739_v3, %v741_v6  ;;  %v793_v9 = vpop.permute.xlu1 %792 }
 0x31d   : > { %747 = vst [vmem:[#allocation3 + $0x8] sm:$0xf0] %v743_v8 }
 0x31f   : > { %v760_v10 = vpop.permute.xlu0 %759 }
 0x320   : > { %v778_v11 = vpop.permute.xlu1 %777 }
 0x323   : > { %v836_v12 = vpop.permute.xlu0 %835 }
 0x324   : > { %v719_v13 = vpop.permute.xlu1 %718 }
 0x327   : > { %v854_v14 = vpop.permute.xlu0 %853 }
 0x328   : > { %v856_v16 = vsel %vm565_vm13, %v852_v5, %v854_v14  ;;  %v756_v17 = vpop.permute.xlu1 %755 }
 0x329   : > { %860 = vst [vmem:[#allocation3 + $0x38] sm:$0xf0] %v856_v16 }
 0x32b   : > { %v737_v18 = vpop.permute.xlu0 %736 }
 0x32c   : > { %v742_v19 = vsel %vm408_vm12, %v737_v18, %v739_v3  ;;  %v795_v21 = vpop.permute.xlu1 %794  ;;  %v997_v3 = vunpack.c.0.s8 %v996_v59 }
 0x32d   : > { %746 = vst [vmem:[#allocation3] sm:$0xf0] %v742_v19  ;;  %v798_v22 = vsel %vm491_vm14, %v793_v9, %v795_v21  ;;  %v799_v23 = vsel %vm491_vm14, %v795_v21, %v797_v2 }
 0x32e   : > { %802 = vst [vmem:[#allocation3 + $0x20] sm:$0xf] %v798_v22  ;;  %803 = vst [vmem:[#allocation3 + $0x28] sm:$0xf] %v799_v23 }
 0x32f   : > { %v780_v24 = vpop.permute.xlu0 %779 }
 0x330   : > { %v782_v25 = vsel %vm473_vm15, %v778_v11, %v780_v24  ;;  %v815_v28 = vpop.permute.xlu1 %814 }
 0x331   : > { %786 = vst [vmem:[#allocation3 + $0x18] sm:$0xf0] %v782_v25 }
 0x333   : > { %v817_v29 = vpop.permute.xlu0 %816 }
 0x334   : > { %v819_v30 = vsel %vm519_vm1, %v815_v28, %v817_v29  ;;  %v832_v33 = vpop.permute.xlu1 %831 }
 0x335   : > { %823 = vst [vmem:[#allocation3 + $0x28] sm:$0xf0] %v819_v30 }
 0x337   : > { %v776_v34 = vpop.permute.xlu0 %775 }
 0x338   : > { %v781_v35 = vsel %vm473_vm15, %v776_v34, %v778_v11  ;;  %v721_v37 = vpop.permute.xlu1 %720  ;;  %v1000_v11 = vsub.s32 %v997_v3, %v1391_v1 }
 0x339   : > { %785 = vst [vmem:[#allocation3 + $0x10] sm:$0xf0] %v781_v35  ;;  %v724_v38 = vsel %vm389_vm2, %v719_v13, %v721_v37  ;;  %v725_v40 = vsel %vm389_vm2, %v721_v37, %v723_v4 }
 0x33a   : > { %728 = vst [vmem:[#allocation3] sm:$0xf] %v724_v38  ;;  %729 = vst [vmem:[#allocation3 + $0x8] sm:$0xf] %v725_v40 }
 0x33b   : > { %v813_v41 = vpop.permute.xlu0 %812 }
 0x33c   : > { %v818_v42 = vsel %vm519_vm1, %v813_v41, %v815_v28  ;;  %v758_v43 = vpop.permute.xlu1 %757  ;;  %v886_v26 = vld [vmem:[#allocation3 + $0x28] sm:$0xff] }
 0x33d   : > { %822 = vst [vmem:[#allocation3 + $0x20] sm:$0xf0] %v818_v42  ;;  %v761_v15 = vsel %vm445_vm3, %v756_v17, %v758_v43  ;;  %v762_v45 = vsel %vm445_vm3, %v758_v43, %v760_v10 }
 0x33e   : > { %765 = vst [vmem:[#allocation3 + $0x10] sm:$0xf] %v761_v15  ;;  %766 = vst [vmem:[#allocation3 + $0x18] sm:$0xf] %v762_v45 }
 0x33f   : > { %v850_v46 = vpop.permute.xlu0 %849 }
 0x340   : > { %v855_v20 = vsel %vm565_vm13, %v850_v46, %v852_v5  ;;  %v834_v47 = vpop.permute.xlu1 %833 }
 0x341   : > { %859 = vst [vmem:[#allocation3 + $0x30] sm:$0xf0] %v855_v20  ;;  %v837_v49 = vsel %vm546_vm6, %v832_v33, %v834_v47  ;;  %v838_v50 = vsel %vm546_vm6, %v834_v47, %v836_v12  ;;  %v882_v31 = vld [vmem:[#allocation3 + $0x8] sm:$0xff]  ;;  %v881_v32 = vld [vmem:[#allocation3] sm:$0xff] }
 0x342   : > { %841 = vst [vmem:[#allocation3 + $0x30] sm:$0xf] %v837_v49  ;;  %842 = vst [vmem:[#allocation3 + $0x38] sm:$0xf] %v838_v50 }
 0x343   : > { %v873_v51 = vpop.permute.xlu0 %872 }
 0x344   : > { %v871_v27 = vpop.permute.xlu1 %870  ;;  %v885_v48 = vld [vmem:[#allocation3 + $0x20] sm:$0xff] }
 0x345   : > { %v875_v52 = vsel %vm592_vm7, %v871_v27, %v873_v51  ;;  %v884_v54 = vld [vmem:[#allocation3 + $0x18] sm:$0xff]  ;;  %v883_v36 = vld [vmem:[#allocation3 + $0x10] sm:$0xff] }
 0x346   : > { %879 = vst [vmem:[#allocation3 + $0x48] sm:$0xf] %v875_v52  ;;  %v1134_v55 = vpack.c.bf16 %v884_v54, %v882_v31  ;;  %v1136_v39 = vpack.c.bf16 %v883_v36, %v881_v32 }
 0x348   : > { %1135 = vmatprep.subr.bf16.mxu1 %v1134_v55  ;;  %v869_v56 = vpop.permute.xlu1 %868 }
 0x349   : > { %v874_v57 = vsel %vm592_vm7, %v869_v56, %v871_v27  ;;  %1137 = vmatpush1.bf16.msra.mxu1 %v1136_v39  ;;  %v888_v44 = vld [vmem:[#allocation3 + $0x38] sm:$0xff]  ;;  %v887_v58 = vld [vmem:[#allocation3 + $0x30] sm:$0xff] }
 0x34a   : > { %878 = vst [vmem:[#allocation3 + $0x40] sm:$0xf] %v874_v57  ;;  %v1138_v60 = vpack.c.bf16 %v888_v44, %v886_v26  ;;  %v1140_v53 = vpack.c.bf16 %v887_v58, %v885_v48 }
 0x34c   : > { %1139 = vmatprep.subr.bf16.mxu1 %v1138_v60 }
 0x34d   : > { %1141 = vmatpush1.bf16.msra.mxu1 %v1140_v53  ;;  %v890_v61 = vld [vmem:[#allocation3 + $0x48] sm:$0xf] }
 0x34e   : > { %1116 = vmatprep.subr.msk.mxu1 %vm620_vm8, %v890_v61 }
 0x351   : > { %v889_v0 = vld [vmem:[#allocation3 + $0x40] sm:$0xf] }
 0x352   : > { %1117 = vmatpush1.msk.msra.mxu1 %vm620_vm8, %v889_v0 }
 0x353   : > { %1118 = vmatmul.mubr.msk.f32.vlgmr.msra.gmra.mrb[0].mxu1 %vm616_vm9, %v880_v63 }
 0x354   : > { %v895_v2 = vpop.permute.xlu0 %894 }
 0x358   : > { %v994_v13 = vpop.permute.xlu0 %993 }
 0x359   : > { %v981_v5 = vpop.permute.xlu1 %980  ;;  %v1001_v16 = vrot.slane %v994_v13, %v1000_v11 }
 0x426   : > { %v972_v4 = vpop.f32.mrb[0].mxu1 }
 0x427   : > { %v973_v6 = vadd.f32 %v972_v4, %v895_v2  ;;  %v974_v8 = vpop.f32.mrb[1].mxu1 }
 0x428   : > { %v975_v9 = vadd.f32 %v974_v8, %v895_v2 }
 0x429   : > { %v983_v10 = vmul.f32 %v981_v5, %v973_v6 }
 0x42a   : > { %v984_v12 = vmul.f32 %v981_v5, %v975_v9 }
 0x42c   : > { %v987_v14 = vcombine.low %v983_v10, %v984_v12 }
 0x42e   : > { %v989_v17 = vadd.f32 %v987_v14, %v1406_v7 }
 0x430   : > { %v1003_v18 = vadd.f32 %v1001_v16, %v989_v17 }
 0x432   : > { %1004 = vst [vmem:[%s324_s21] sm:$0xff] %v1003_v18 }
 0x433   : > { %1223 = shalt.err (!%p1220_p3)
}
 0x434   : > { %s1224_s18 = scalar_lea.hbm %s1614_s10, 128  ;;  %s1228_s26 = scalar_lea.hbm %s1664_s8, 256 }
 0x435   : > { %p1225_p4 = scmp.ne.s32.totalorder %s1614_s10, %s1224_s18  ;;  %p1229_p9 = scmp.lt.u32.totalorder %s1614_s10, %s1664_s8 }
 0x436   : > { %p1230_p10 = scmp.lt.u32.totalorder %s1228_s26, %s1224_s18  ;;  %p1232_p12 = scmp.lt.u32.totalorder %s1224_s18, %s1614_s10 }
 0x437   : > { %p1226_p7 = pnand %p1225_p4, %p1377_p5 }
 0x438   : > { %p1231_p11 = por %p1230_p10, %p1229_p9 }
 0x439   : > { %p1227_p8 = pneg %p1226_p7 }
 0x43a   : > { %p1233_p13 = por %p1232_p12, %p1231_p11 }
 0x43c   : > { %p1234_p0 = pnand %p1233_p13, %p1227_p8 }
 0x43e   : > { %1237 = shalt.err (!%p1234_p0)
}
 0x43f   : > { %1142 = dma.vmem_to_hbm [thread:$0]  (%p1377_p5), %s1616_s22, 128, %s1614_s10, %s1006_s24  }
 0x440 PF: > { %p1148_p1 = scmp.ge.s32.totalorder %s1272_s30, 2  ;;  %s1032_s25 = sand.u32 1, %s1260_s27  }
 0x441   : > { %s1033_s12 = scalar_lea.sflag [#allocation5], %s1032_s25 }
 0x442   : > { %p1145_p2 = pnand %p1148_p1, %p1381_p6 }
 0x444   : > { %1255 = dma.done.wait (!%p1145_p2), %s1033_s12, 128  }
 0x445   : > { %1257 = vsyncadd (!%p1145_p2), %s1033_s12, 4294967168  ;;  %p18_p3 = scmp.ge.s32.totalorder %s1364_s11, 4   ;;  %s1669_s27 = smov %s1264_s28 }
 0x446   : > { %s1670_s28 = smov %s1268_s29  ;;  %s1671_s29 = smov %s1375_s14 }
 0x447   : > { %s1672_s30 = smov %s1364_s11  ;;  %20 = sbr.rel (!%p18_p3) target bundleno = 3 (0x3), region = 94 }
 0x44e   :  { %1038 = vsyncpa [#allocation5], 1 }
 0x44f   :  { %1040 = vsyncpa [#allocation5 + $0x1], 1 }

</bundles_post_ra>
